<compile_context>
chip_gen: v7x
topology: tpu7x:2x2x1
jax: 0.10.0
libtpu: 0.0.40
codegen_flags: <defaults>
</compile_context>

<pallas_src>
import functools

import jax
import jax.numpy as jnp
from jax.experimental import pallas as pl
from jax.experimental.pallas import tpu as pltpu


def _round_up(x, m):
    return (x + m - 1) // m * m


def a3c_critic_kernel(x_ref, w1_ref, b1_ref, w2_ref, b2_ref, wv_ref, bv_ref,
                      out_ref, *, compute_dtype):
    """Fused MLP critic: (Linear+ReLU) x2 -> value head.

    x_ref : (TB, D)   f32 (cast to compute_dtype in-register if requested)
    w1_ref: (D, H)    compute dtype
    b1_ref: (1, H)    f32
    w2_ref: (H, H)    compute dtype
    b2_ref: (1, H)    f32
    wv_ref: (H, 1)    f32   (value head as a column -> plain MXU matmul)
    bv_ref: (1, 1)    f32
    out_ref: (TB, 1)  f32
    """
    # In-kernel cast (near-free VPU op on a VMEM-resident tile); avoids an
    # extra wrapper-side HBM read+write pass over the whole batch.
    x = x_ref[...].astype(compute_dtype)                        # (TB, D)
    h1 = jnp.dot(x, w1_ref[...], preferred_element_type=jnp.float32)
    h1 = jnp.maximum(h1 + b1_ref[...], 0.0)                     # (TB, H) f32
    h2 = jnp.dot(h1.astype(w2_ref.dtype), w2_ref[...],
                 preferred_element_type=jnp.float32)
    h2 = jnp.maximum(h2 + b2_ref[...], 0.0)                     # (TB, H) f32

    # Value head (out_features == 1): ordinary (TB,H)@(H,1) MXU matmul — no
    # transpose of the large h2 operand, tiny (TB,1) masked column store.
    v = jnp.dot(h2, wv_ref[...], preferred_element_type=jnp.float32)  # (TB,1)
    out_ref[...] = v + bv_ref[...]


def _auto_block_b(batch, max_tile=2048):
    """Pick the batch tile: one full (sublane-aligned) tile when it fits,
    otherwise roughly-equal tiles capped at max_tile rows."""
    bp = _round_up(batch, 8)
    if bp <= max_tile:
        return bp
    g = pl.cdiv(bp, max_tile)
    return _round_up(pl.cdiv(bp, g), 8)


def a3c_critic_forward(state, params, *, block_b=None,
                       compute_dtype=jnp.float32,
                       small_batch_threshold=256, force_pallas=False):
    """Run the critic forward pass.

    state : (batch, obs_dim) float32
    params: dict with w1 (D,H), b1 (1,H), w2 (H,H), b2 (1,H), wv (H,1), bv (1,1)
    block_b: batch tile (rows per grid step). Default: auto,
             ~min(round_up(batch, 8), 2048). On v7x with large batches, pass
             ~round_up(cdiv(batch, 2), 8) so both TensorCores get grid steps.
    compute_dtype: jnp.float32 or jnp.bfloat16 for the two hidden matmuls
             (f32 accumulation; bias/ReLU/value head stay f32). Leave f32 on v5e.
    small_batch_threshold / force_pallas: batches below the threshold use the
             plain-JAX fused MLP (kernel launch + pad overhead would dominate)
             unless force_pallas=True.
    returns values: (batch, 1) float32
    """
    state = state.astype(jnp.float32)
    B, D = state.shape
    H = params["w1"].shape[1]

    # Small-batch fast path: XLA's fused MLP beats a 1-tile Pallas call with
    # fixed pipeline overhead at actor-step-sized batches.
    if B < small_batch_threshold and not force_pallas:
        return reference_forward(state, params)

    if block_b is None:
        block_b = _auto_block_b(B)
    block_b = _round_up(int(block_b), 8)

    G = int(pl.cdiv(B, block_b))
    Bp = G * block_b
    if Bp != B:
        # Only pads to the sublane multiple / tile multiple when needed; the
        # auto tile keeps this to < 8 (or < one tile) dead rows.
        state = jnp.pad(state, ((0, Bp - B), (0, 0)))

    # State stays f32 on the wire; the (cheap, small) weights are cast
    # wrapper-side once.
    w1 = params["w1"].astype(compute_dtype)
    w2 = params["w2"].astype(compute_dtype)
    b1 = params["b1"].astype(jnp.float32)
    b2 = params["b2"].astype(jnp.float32)
    wv = params["wv"].reshape(H, 1).astype(jnp.float32)
    bv = params["bv"].reshape(1, 1).astype(jnp.float32)

    # Weights/biases: constant index_map -> VMEM-resident across all tiles
    # (DMA'd once; a few KB total, so no extra buffering tuning needed).
    res = lambda shape: pl.BlockSpec(shape, lambda i: (0, 0))

    flops = 2 * Bp * (D * H + H * H + H)
    bytes_accessed = 4 * (Bp * D + Bp + D * H + H * H + 3 * H + 1)

    out = pl.pallas_call(
        functools.partial(a3c_critic_kernel, compute_dtype=compute_dtype),
        out_shape=jax.ShapeDtypeStruct((Bp, 1), jnp.float32),
        grid=(G,),
        in_specs=[
            pl.BlockSpec((block_b, D), lambda i: (i, 0)),  # state (pipelined)
            res((D, H)),   # w1
            res((1, H)),   # b1
            res((H, H)),   # w2
            res((1, H)),   # b2
            res((H, 1)),   # wv (column)
            res((1, 1)),   # bv
        ],
        out_specs=pl.BlockSpec((block_b, 1), lambda i: (i, 0)),
        compiler_params=pltpu.CompilerParams(
            # Batch tiles are independent -> shard across v7x's two TCs.
            dimension_semantics=("parallel",)),
        cost_estimate=pl.CostEstimate(
            flops=flops, transcendentals=0, bytes_accessed=bytes_accessed),
    )(state, w1, b1, w2, b2, wv, bv)

    return out[:B]


def init_params(key, obs_dim, hidden):
    """Deterministic synthetic parameter init (uniform, PyTorch-Linear-like)."""
    ks = jax.random.split(key, 6)

    def lin(kw, kb, fan_in, fan_out):
        bound = 1.0 / jnp.sqrt(fan_in)
        w = jax.random.uniform(kw, (fan_in, fan_out), jnp.float32, -bound, bound)
        b = jax.random.uniform(kb, (1, fan_out), jnp.float32, -bound, bound)
        return w, b

    w1, b1 = lin(ks[0], ks[1], obs_dim, hidden)
    w2, b2 = lin(ks[2], ks[3], hidden, hidden)
    wv, bv = lin(ks[4], ks[5], hidden, 1)
    return dict(w1=w1, b1=b1, w2=w2, b2=b2, wv=wv, bv=bv)


def reference_forward(state, p):
    """Plain JAX reference (also the small-batch fast path)."""
    h1 = jnp.maximum(state @ p["w1"] + p["b1"], 0.0)
    h2 = jnp.maximum(h1 @ p["w2"] + p["b2"], 0.0)
    return h2 @ p["wv"].reshape(-1, 1) + p["bv"].reshape(1, 1)


if __name__ == "__main__":
    key = jax.random.PRNGKey(0)
    k_state, k_params, k_big = jax.random.split(key, 3)

    batch, obs_dim, hidden = 8, 24, 32      # small shapes consistent with forward
    state = jax.random.normal(k_state, (batch, obs_dim), jnp.float32)
    params = init_params(k_params, obs_dim, hidden)
    ref = reference_forward(state, params)

    # 1) Default path for a tiny actor-step batch: plain-JAX fast path.
    vals_fast = jax.block_until_ready(a3c_critic_forward(state, params))
    assert vals_fast.shape == (batch, 1)
    assert jnp.allclose(vals_fast, ref, atol=2e-5, rtol=2e-5)

    # 2) Force the Pallas kernel at the small batch (single 8-row tile, no pad).
    values = jax.block_until_ready(
        a3c_critic_forward(state, params, force_pallas=True))
    assert values.shape == (batch, 1)
    assert jnp.allclose(values, ref, atol=2e-5, rtol=2e-5)

    # 3) Learner-sized batch: auto tile -> grid > 1 plus a small tail pad.
    big_batch = 2050
    big_state = jax.random.normal(k_big, (big_batch, obs_dim), jnp.float32)
    big_vals = jax.block_until_ready(a3c_critic_forward(big_state, params))
    big_ref = reference_forward(big_state, params)
    assert big_vals.shape == (big_batch, 1)
    assert jnp.allclose(big_vals, big_ref, atol=2e-5, rtol=2e-5)

    # 4) Opt-in bf16 hidden-matmul path (v6e/v7x); cast happens in-kernel.
    vals_bf16 = jax.block_until_ready(
        a3c_critic_forward(state, params, compute_dtype=jnp.bfloat16,
                           force_pallas=True))
    assert vals_bf16.shape == (batch, 1)
    assert jnp.allclose(vals_bf16, ref, atol=5e-2, rtol=5e-2)

    print("KERNEL_OK")
</pallas_src>

<mosaic_0001>
module attributes {stable_mosaic.version = 11 : i64} {
  func.func @a3c_critic_kernel(%arg0: i32, %arg1: memref<8x24xf32, #tpu.memory_space<vmem>>, %arg2: memref<24x32xf32, #tpu.memory_space<vmem>>, %arg3: memref<1x32xf32, #tpu.memory_space<vmem>>, %arg4: memref<32x32xf32, #tpu.memory_space<vmem>>, %arg5: memref<1x32xf32, #tpu.memory_space<vmem>>, %arg6: memref<32x1xf32, #tpu.memory_space<vmem>>, %arg7: memref<1x1xf32, #tpu.memory_space<vmem>>, %arg8: memref<8x1xf32, #tpu.memory_space<vmem>>) attributes {dimension_semantics = [#tpu.dimension_semantics<parallel>], iteration_bounds = array<i64: 1>, scalar_prefetch = 0 : i64, scratch_operands = 0 : i64, tpu.core_type = #tpu.core_type<tc>, window_params = [{transform_indices = @transform_0, window_bounds = array<i64: 8, 24>}, {pipeline_mode = #tpu.pipeline_mode<synchronous>, transform_indices = @transform_1, window_bounds = array<i64: 24, 32>}, {pipeline_mode = #tpu.pipeline_mode<synchronous>, transform_indices = @transform_2, window_bounds = array<i64: 1, 32>}, {pipeline_mode = #tpu.pipeline_mode<synchronous>, transform_indices = @transform_3, window_bounds = array<i64: 32, 32>}, {pipeline_mode = #tpu.pipeline_mode<synchronous>, transform_indices = @transform_4, window_bounds = array<i64: 1, 32>}, {pipeline_mode = #tpu.pipeline_mode<synchronous>, transform_indices = @transform_5, window_bounds = array<i64: 32, 1>}, {pipeline_mode = #tpu.pipeline_mode<synchronous>, transform_indices = @transform_6, window_bounds = array<i64: 1, 1>}, {transform_indices = @transform_7, window_bounds = array<i64: 8, 1>}]} {
    %c0 = arith.constant 0 : index
    %c0_0 = arith.constant 0 : index
    %0 = vector.load %arg1[%c0, %c0_0] : memref<8x24xf32, #tpu.memory_space<vmem>>, vector<8x24xf32>
    %c0_1 = arith.constant 0 : index
    %c0_2 = arith.constant 0 : index
    %1 = vector.load %arg2[%c0_1, %c0_2] : memref<24x32xf32, #tpu.memory_space<vmem>>, vector<24x32xf32>
    %cst = arith.constant dense<0.000000e+00> : vector<8x32xf32>
    %2 = tpu.matmul %0, %1, %cst {dimension_numbers = #tpu.dot_dimension_numbers<[1], [0], [0], [1], [0, 0, 1, 1], [], []>} : vector<8x24xf32>, vector<24x32xf32>, vector<8x32xf32> -> vector<8x32xf32>
    %c0_3 = arith.constant 0 : index
    %c0_4 = arith.constant 0 : index
    %3 = vector.load %arg3[%c0_3, %c0_4] : memref<1x32xf32, #tpu.memory_space<vmem>>, vector<1x32xf32>
    %4 = vector.broadcast %3 : vector<1x32xf32> to vector<8x32xf32>
    %5 = arith.addf %2, %4 : vector<8x32xf32>
    %cst_5 = arith.constant 0.000000e+00 : f32
    %6 = vector.broadcast %cst_5 : f32 to vector<8x32xf32>
    %7 = arith.maximumf %5, %6 : vector<8x32xf32>
    %c0_6 = arith.constant 0 : index
    %c0_7 = arith.constant 0 : index
    %8 = vector.load %arg4[%c0_6, %c0_7] : memref<32x32xf32, #tpu.memory_space<vmem>>, vector<32x32xf32>
    %cst_8 = arith.constant dense<0.000000e+00> : vector<8x32xf32>
    %9 = tpu.matmul %7, %8, %cst_8 {dimension_numbers = #tpu.dot_dimension_numbers<[1], [0], [0], [1], [0, 0, 1, 1], [], []>} : vector<8x32xf32>, vector<32x32xf32>, vector<8x32xf32> -> vector<8x32xf32>
    %c0_9 = arith.constant 0 : index
    %c0_10 = arith.constant 0 : index
    %10 = vector.load %arg5[%c0_9, %c0_10] : memref<1x32xf32, #tpu.memory_space<vmem>>, vector<1x32xf32>
    %11 = vector.broadcast %10 : vector<1x32xf32> to vector<8x32xf32>
    %12 = arith.addf %9, %11 : vector<8x32xf32>
    %cst_11 = arith.constant 0.000000e+00 : f32
    %13 = vector.broadcast %cst_11 : f32 to vector<8x32xf32>
    %14 = arith.maximumf %12, %13 : vector<8x32xf32>
    %c0_12 = arith.constant 0 : index
    %c0_13 = arith.constant 0 : index
    %15 = vector.load %arg6[%c0_12, %c0_13] : memref<32x1xf32, #tpu.memory_space<vmem>>, vector<32x1xf32>
    %cst_14 = arith.constant dense<0.000000e+00> : vector<8x1xf32>
    %16 = tpu.matmul %14, %15, %cst_14 {dimension_numbers = #tpu.dot_dimension_numbers<[1], [0], [0], [1], [0, 0, 1, 1], [], []>} : vector<8x32xf32>, vector<32x1xf32>, vector<8x1xf32> -> vector<8x1xf32>
    %c0_15 = arith.constant 0 : index
    %c0_16 = arith.constant 0 : index
    %17 = vector.load %arg7[%c0_15, %c0_16] : memref<1x1xf32, #tpu.memory_space<vmem>>, vector<1x1xf32>
    %18 = vector.broadcast %17 : vector<1x1xf32> to vector<8x1xf32>
    %19 = arith.addf %16, %18 : vector<8x1xf32>
    %c0_17 = arith.constant 0 : index
    %c0_18 = arith.constant 0 : index
    %20 = vector.load %arg8[%c0_17, %c0_18] : memref<8x1xf32, #tpu.memory_space<vmem>>, vector<8x1xf32>
    tpu.vector_store %arg8[%c0_17, %c0_18], %19 {strides = array<i32>} : memref<8x1xf32, #tpu.memory_space<vmem>>, vector<8x1xf32>,
    return
  }
  func.func @transform_0(%arg0: i32) -> (i32, i32) {
    %c0_i32 = arith.constant 0 : i32
    %c0_i32_0 = arith.constant 0 : i32
    return %arg0, %c0_i32 : i32, i32
  }
  func.func @transform_1(%arg0: i32) -> (i32, i32) {
    %c0_i32 = arith.constant 0 : i32
    %c0_i32_0 = arith.constant 0 : i32
    %c0_i32_1 = arith.constant 0 : i32
    return %c0_i32, %c0_i32_0 : i32, i32
  }
  func.func @transform_2(%arg0: i32) -> (i32, i32) {
    %c0_i32 = arith.constant 0 : i32
    %c0_i32_0 = arith.constant 0 : i32
    %c0_i32_1 = arith.constant 0 : i32
    return %c0_i32, %c0_i32_0 : i32, i32
  }
  func.func @transform_3(%arg0: i32) -> (i32, i32) {
    %c0_i32 = arith.constant 0 : i32
    %c0_i32_0 = arith.constant 0 : i32
    %c0_i32_1 = arith.constant 0 : i32
    return %c0_i32, %c0_i32_0 : i32, i32
  }
  func.func @transform_4(%arg0: i32) -> (i32, i32) {
    %c0_i32 = arith.constant 0 : i32
    %c0_i32_0 = arith.constant 0 : i32
    %c0_i32_1 = arith.constant 0 : i32
    return %c0_i32, %c0_i32_0 : i32, i32
  }
  func.func @transform_5(%arg0: i32) -> (i32, i32) {
    %c0_i32 = arith.constant 0 : i32
    %c0_i32_0 = arith.constant 0 : i32
    %c0_i32_1 = arith.constant 0 : i32
    return %c0_i32, %c0_i32_0 : i32, i32
  }
  func.func @transform_6(%arg0: i32) -> (i32, i32) {
    %c0_i32 = arith.constant 0 : i32
    %c0_i32_0 = arith.constant 0 : i32
    %c0_i32_1 = arith.constant 0 : i32
    return %c0_i32, %c0_i32_0 : i32, i32
  }
  func.func @transform_7(%arg0: i32) -> (i32, i32) {
    %c0_i32 = arith.constant 0 : i32
    %c0_i32_0 = arith.constant 0 : i32
    return %arg0, %c0_i32 : i32, i32
  }
}

</mosaic_0001>

<bundles_post_ra>
// kernel: tpu_custom_call.1
= control target key start
LH: loop header
LB: loop body
LE: loop exit
PB: predicated region body
PF: predicated region fallthrough
CT: control target
= control target key end

     0   :  { %s501_s0 = inlined_call_operand.vmem [shape: f32[8,24], index: 0, kind: input, shape index: {}]   ;;  %s502_s1 = inlined_call_operand.hbm [shape: f32[24,32], index: 1, kind: input, shape index: {}]   ;;  %s503_s2 = inlined_call_operand.vmem [shape: f32[1,32], index: 2, kind: input, shape index: {}]   ;;  %s504_s3 = inlined_call_operand.vmem [shape: f32[32,32], index: 3, kind: input, shape index: {}]   ;;  %s505_s4 = inlined_call_operand.vmem [shape: f32[1,32], index: 4, kind: input, shape index: {}]   ;;  %s506_s5 = inlined_call_operand.vmem [shape: f32[32,1], index: 5, kind: input, shape index: {}]   ;;  %s507_s6 = inlined_call_operand.<no memory space> [shape: f32[1,1], index: 6, kind: input, shape index: {}]   ;;  %s508_s7 = inlined_call_operand.vmem [shape: f32[8,1], index: 7, kind: output, shape index: {}]  }
   0x1   :  { %v12_v0 = vstv %s507_s6 }
   0x2   :  { %13 = vst [vmem:[#allocation2] sm:$0x1] %v12_v0 }
   0x3   :  { %14 = vsyncpa [#allocation4], 0  ;;  %s401_s26 = smov [#allocation3]   ;;  %s377_s30 = scalar_lea.hbm %s502_s1, 384 }
   0x4   :  { %s22_s27 = sshll.u32 %s401_s26, 4  ;;  %p378_p0 = scmp.ne.s32.totalorder %s502_s1, %s377_s30  ;;  %s23_s27 = int_to_ptr.vmem [resolvable:$true] %s22_s27 }
   0x5   :  { %p381_p1 = scmp.lt.u32.totalorder %s377_s30, %s502_s1 }
   0x7   :  { %p383_p2 = pnand %p381_p1, %p378_p0 }
   0x9   :  { %386 = shalt.err (!%p383_p2)
}
   0xa   :  { %s387_s6 = scalar_lea.vmem %s23_s27, 384  ;;  %p392_p4 = scmp.lt.s32.totalorder %s23_s27, %s23_s27 }
   0xb   :  { %p388_p3 = scmp.ne.s32.totalorder %s23_s27, %s387_s6  ;;  %p393_p5 = scmp.lt.s32.totalorder %s387_s6, %s387_s6 }
   0xd   :  { %p394_p6 = por %p393_p5, %p392_p4 }
   0xf   :  { %p395_p7 = pnand %p394_p6, %p388_p3 }
  0x11   :  { %398 = shalt.err (!%p395_p7)
}
  0x12   :  { %s402_s12 = smov 128   ;;  %s403_s13 = smov 8  }
  0x13   :  { %28 = dma.hbm_to_vmem [thread:$0]  %s502_s1, 384, %s23_s27, [#allocation4], %s402_s12, %s402_s12, %s403_s13  }
  0x14   :  { %399 = dma.done.wait [#allocation4], 384  }
  0x15   :  { %400 = vsyncadd [#allocation4], 4294966912  ;;  %v404_v1 = vmov 0.0|0.0   ;;  %vm405_vm0 = vmmov 0   ;;  %v406_v2 = vmov 0.0   ;;  %v43_v3 = vld [vmem:[#allocation3] sm:$0xff] }
  0x16   :  { %356 = vmatprep.subr.bf16.mxu0 %v404_v1  ;;  %331 = vmatprep.mubr.msk.f32.mxu0 %vm405_vm0, %v406_v2  ;;  %v44_v4 = vld [vmem:[#allocation3 + $0x8] sm:$0xff]  ;;  %v128_v6 = vld [vmem:[%s504_s3] sm:$0xff]  ;;  %v45_v9 = vld [vmem:[#allocation3 + $0x10] sm:$0xff]  ;;  %vm53_vm1 = vcmask 195584   ;;  %vm139_vm2 = vcmask 261120   ;;  %vm298_vm3 = vcmask 7168  }
  0x17   :  { %359 = vmatprep.subr.bf16.mxu1 %v404_v1  ;;  %342 = vmatprep.mubr.msk.f32.mxu1 %vm405_vm0, %v406_v2  ;;  %v357_v5 = vpack.c.bf16 %v44_v4, %v43_v3  ;;  %v129_v7 = vld [vmem:[%s504_s3 + $0x8] sm:$0xff]  ;;  %v42_v10 = vld [vmem:[%s501_s0] sm:$0xff]  ;;  %v130_v11 = vld [vmem:[%s504_s3 + $0x10] sm:$0xff] }
  0x18   :  { %v360_v8 = vpack.c.bf16 %v129_v7, %v128_v6  ;;  %v131_v12 = vld [vmem:[%s504_s3 + $0x18] sm:$0xff]  ;;  %v214_v14 = vld [vmem:[%s506_s5] sm:$0xff]  ;;  %v215_v15 = vld [vmem:[%s506_s5 + $0x8] sm:$0xff] }
  0x19   :  { %358 = vmatpush3.bf16.msra.mxu0 %v357_v5  ;;  %v363_v13 = vpack.c.bf16 %v131_v12, %v130_v11  ;;  %v366_v16 = vpack.c.bf16 %v215_v15, %v214_v14  ;;  %v305_v17 = vld [vmem:[%s503_s2] ss:$0 sm:$0xff]  ;;  %v216_v22 = vld [vmem:[%s506_s5 + $0x10] sm:$0xff]  ;;  %v217_v23 = vld [vmem:[%s506_s5 + $0x18] sm:$0xff] }
  0x1a   :  { %329 = vmatprep.subr.mxu0 %v406_v2  ;;  %361 = vmatpush3.bf16.msra.mxu1 %v360_v8  ;;  %v369_v24 = vpack.c.bf16 %v217_v23, %v216_v22  ;;  %v307_v25 = vld [vmem:[%s505_s4] ss:$0 sm:$0xff] }
  0x1b   :  { %362 = vmatprep.subr.bf16.mxu1 %v404_v1  ;;  %v309_v30 = vld [vmem:[#allocation2] ss:$0 sm:$0xff] }
  0x1d   :  { %330 = vmatpush3.msra.mxu0 %v45_v9 }
  0x1e   :  { %332 = vmatmul.mubr.msk.f32.vlgmr.msra.gmra.mrb[0].mxu0 %vm53_vm1, %v42_v10  ;;  %365 = vmatprep.subr.bf16.mxu0 %v404_v1 }
  0x1f   :  { %353 = vmatprep.mubr.msk.f32.mxu0 %vm405_vm0, %v406_v2  ;;  %364 = vmatpush3.bf16.msra.mxu1 %v363_v13 }
  0x20   :  { %367 = vmatpush3.bf16.msra.mxu0 %v366_v16 }
  0x21   :  { %368 = vmatprep.subr.bf16.mxu0 %v404_v1 }
  0x24   :  { %370 = vmatpush3.bf16.msra.mxu0 %v369_v24 }
  0xf1   :  { %v123_v18 = vpop.f32.mrb[0].mxu0 }
  0xf2   :  { %v124_v19 = vadd.f32 %v305_v17, %v123_v18  ;;  %v333_v20 = vpop.f32.mrb[1].mxu0 }
  0xf4   :  { %v127_v21 = vmax.f32 %v124_v19, 0.0 }
  0xf6   :  { %343 = vmatmul.mubr.msk.f32.vlgmr.msra.gmra.mrb[0].mxu1 %vm139_vm2, %v127_v21 }
 0x1c9   :  { %v209_v26 = vpop.f32.mrb[0].mxu1 }
 0x1ca   :  { %v210_v27 = vadd.f32 %v307_v25, %v209_v26  ;;  %v344_v28 = vpop.f32.mrb[1].mxu1 }
 0x1cc   :  { %v213_v29 = vmax.f32 %v210_v27, 0.0 }
 0x1ce   :  { %354 = vmatmul.mubr.msk.f32.vlgmr.msra.gmra.mrb[2].mxu0 %vm139_vm2, %v213_v29 }
 0x2a1   :  { %v294_v31 = vpop.f32.mrb[2].mxu0 }
 0x2a2   :  { %v295_v32 = vadd.f32 %v309_v30, %v294_v31  ;;  %v355_v33 = vpop.f32.mrb[3].mxu0 }
 0x2a4   :  { %299 = vst.msk [vmem:[%s508_s7] sm:$0xff] %vm298_vm3, %v295_v32 }
 0x2a5   :  { %304 = vsyncpa [#allocation4], 1 }

</bundles_post_ra>
